<compile_context>
chip_gen: v7x
topology: tpu7x:2x2x1
jax: 0.10.0
libtpu: 0.0.40
codegen_flags: <defaults>
</compile_context>

<pallas_src>
import jax
import jax.numpy as jnp
from jax.experimental import pallas as pl
from jax.experimental.pallas import tpu as pltpu


def _bottleneck_kernel(x_ref, w1_ref, b1_ref, w2_ref, b2_ref, w3_ref, b3_ref,
                       out_ref):
    """Fused Bottleneck for one batch element (one grid step).

    x_ref   : (H, W*Cin)            lane-dense input rows (identity path too)
    w1_ref  : (W*Cin,  W*Cmid)      block-diagonal conv1 weights (BN1 folded)
    b1_ref  : (1, W*Cmid)           conv1+BN1 bias, tiled over W
    w2_ref  : (3, W*Cmid, W*Cmid)   banded conv2 weights per kernel row (BN2 folded)
    b2_ref  : (1, W*Cmid)
    w3_ref  : (W*Cmid, W*Cout)      block-diagonal conv3 weights (BN3 folded)
    b3_ref  : (1, W*Cout)
    out_ref : (H, W*Cout)           Cout == Cin (identity residual)
    """
    x = x_ref[...]                                               # (H, W*Cin)

    # ---- conv1 (1x1) + BN1 + ReLU: one lane-dense MXU matmul ----
    h1 = jnp.dot(x, w1_ref[...], preferred_element_type=jnp.float32)
    h1 = jnp.maximum(h1 + b1_ref[...], 0.0)                      # (H, W*Cmid)

    # ---- conv2 (3x3, pad=1) + BN2 + ReLU ----
    # Width taps + channel contraction live in the banded weights; height taps
    # are sublane row shifts with zero fill (this *is* the H padding).
    zrow = jnp.zeros((1, h1.shape[1]), jnp.float32)
    h1_up = jnp.concatenate([zrow, h1[:-1, :]], axis=0)          # row h-1
    h1_dn = jnp.concatenate([h1[1:, :], zrow], axis=0)           # row h+1
    acc2 = jnp.dot(h1_up, w2_ref[0], preferred_element_type=jnp.float32)
    acc2 = acc2 + jnp.dot(h1, w2_ref[1], preferred_element_type=jnp.float32)
    acc2 = acc2 + jnp.dot(h1_dn, w2_ref[2], preferred_element_type=jnp.float32)
    h2 = jnp.maximum(acc2 + b2_ref[...], 0.0)                    # (H, W*Cmid)

    # ---- conv3 (1x1) + BN3, residual add (identity), ReLU ----
    h3 = jnp.dot(h2, w3_ref[...], preferred_element_type=jnp.float32)
    out_ref[...] = jnp.maximum(h3 + b3_ref[...] + x, 0.0)        # (H, W*Cout)


def _fold_bn(w_oihw, conv_bias, bn, eps):
    """Fold eval-mode BN into conv weights/bias.  Returns HWIO weights."""
    gamma, beta, mean, var = bn
    scale = gamma / jnp.sqrt(var + eps)                          # (Cout,)
    w_eff = jnp.transpose(w_oihw, (2, 3, 1, 0)).astype(jnp.float32) * scale
    b_eff = scale * (conv_bias - mean) + beta
    return w_eff, b_eff.astype(jnp.float32)


def bottleneck_forward(x_nchw, params, eps=1e-5):
    """params = ((w1, b1, bn1), (w2, b2, bn2), (w3, b3, bn3)); bn = (g, b, mean, var)."""
    (w1, b1c, bn1), (w2, b2c, bn2), (w3, b3c, bn3) = params
    N, Cin, H, W = x_nchw.shape
    Cmid = w1.shape[0]
    Cout = w3.shape[0]

    assert Cout == Cin, "identity residual requires in_channels == out_channels*4"
    # Lane-dense layout constraints for this toy-channel regime.
    assert H % 8 == 0 and (W * Cin) % 128 == 0 and (W * Cmid) % 128 == 0, \
        "lane-dense layout needs H%8==0 and W*C multiples of 128"

    # NCHW -> NHWC -> lane-dense (N*H, W*Cin) rows (done once in the wrapper).
    x_nhwc = jnp.transpose(x_nchw, (0, 2, 3, 1)).astype(jnp.float32)
    x2d = x_nhwc.reshape(N * H, W * Cin)

    # Fold BN into conv weights (scale) and a single bias per output channel.
    w1_eff, b1_eff = _fold_bn(w1, b1c, bn1, eps)   # (1,1,Cin,Cmid)
    w2_eff, b2_eff = _fold_bn(w2, b2c, bn2, eps)   # (3,3,Cmid,Cmid)
    w3_eff, b3_eff = _fold_bn(w3, b3c, bn3, eps)   # (1,1,Cmid,Cout)

    eye_w = jnp.eye(W, dtype=jnp.float32)
    # 1x1 convs on the (.., W*C) layout = block-diagonal matmuls.
    w1_big = jnp.kron(eye_w, w1_eff[0, 0])                       # (W*Cin,  W*Cmid)
    w3_big = jnp.kron(eye_w, w3_eff[0, 0])                       # (W*Cmid, W*Cout)
    # 3x3 conv width taps: banded weight per kernel row dy.  The shifted-eye
    # kron automatically truncates at the left/right edges (width padding).
    w2_band = jnp.stack([
        sum(jnp.kron(jnp.eye(W, k=1 - dx, dtype=jnp.float32), w2_eff[dy, dx])
            for dx in range(3))
        for dy in range(3)], axis=0)                             # (3, W*Cmid, W*Cmid)

    b1_t = jnp.tile(b1_eff, W).reshape(1, W * Cmid)
    b2_t = jnp.tile(b2_eff, W).reshape(1, W * Cmid)
    b3_t = jnp.tile(b3_eff, W).reshape(1, W * Cout)

    out2d = pl.pallas_call(
        _bottleneck_kernel,
        out_shape=jax.ShapeDtypeStruct((N * H, W * Cout), jnp.float32),
        grid_spec=pltpu.PrefetchScalarGridSpec(
            num_scalar_prefetch=0,
            grid=(N,),  # one batch element per grid step; Pallas double-buffers
            in_specs=[
                pl.BlockSpec((H, W * Cin), lambda n: (n, 0)),
                pl.BlockSpec((W * Cin, W * Cmid), lambda n: (0, 0)),
                pl.BlockSpec((1, W * Cmid), lambda n: (0, 0)),
                pl.BlockSpec((3, W * Cmid, W * Cmid), lambda n: (0, 0, 0)),
                pl.BlockSpec((1, W * Cmid), lambda n: (0, 0)),
                pl.BlockSpec((W * Cmid, W * Cout), lambda n: (0, 0)),
                pl.BlockSpec((1, W * Cout), lambda n: (0, 0)),
            ],
            out_specs=pl.BlockSpec((H, W * Cout), lambda n: (n, 0)),
        ),
        compiler_params=pltpu.CompilerParams(
            # Batch axis is independent -> megacore-shardable.
            dimension_semantics=("parallel",),
        ),
    )(x2d, w1_big, b1_t, w2_band, b2_t, w3_big, b3_t)

    return jnp.transpose(out2d.reshape(N, H, W, Cout), (0, 3, 1, 2))  # NCHW


def _ref_forward(x, params, eps=1e-5):
    """Pure-JAX eval-mode reference of the PyTorch Bottleneck."""
    (w1, b1c, bn1), (w2, b2c, bn2), (w3, b3c, bn3) = params

    def conv(x, w, b, pad):
        y = jax.lax.conv_general_dilated(
            x, w, window_strides=(1, 1), padding=((pad, pad), (pad, pad)),
            dimension_numbers=("NCHW", "OIHW", "NCHW"))
        return y + b[None, :, None, None]

    def bn(x, p):
        g, be, m, v = (a[None, :, None, None] for a in p)
        return (x - m) / jnp.sqrt(v + eps) * g + be

    h = jax.nn.relu(bn(conv(x, w1, b1c, 0), bn1))
    h = jax.nn.relu(bn(conv(h, w2, b2c, 1), bn2))
    h = bn(conv(h, w3, b3c, 0), bn3)
    return jax.nn.relu(h + x)


if __name__ == "__main__":
    key = jax.random.PRNGKey(0)
    # Bottleneck with out_channels=8, expansion=4 -> in_channels = 32 so the
    # identity residual (i_downsample=None, stride=1) is valid.
    N, Cin, H, W = 2, 32, 16, 16
    Cmid = 8
    Cout = Cmid * 4
    assert Cout == Cin

    ks = jax.random.split(key, 20)
    x = jax.random.normal(ks[0], (N, Cin, H, W), jnp.float32)

    def make_bn(k, c):
        k1, k2, k3, k4 = jax.random.split(k, 4)
        return (1.0 + 0.1 * jax.random.normal(k1, (c,), jnp.float32),   # gamma
                0.1 * jax.random.normal(k2, (c,), jnp.float32),         # beta
                0.1 * jax.random.normal(k3, (c,), jnp.float32),         # running_mean
                jax.random.uniform(k4, (c,), jnp.float32, 0.5, 1.5))    # running_var

    w1 = 0.1 * jax.random.normal(ks[1], (Cmid, Cin, 1, 1), jnp.float32)
    b1 = 0.1 * jax.random.normal(ks[2], (Cmid,), jnp.float32)
    w2 = 0.1 * jax.random.normal(ks[3], (Cmid, Cmid, 3, 3), jnp.float32)
    b2 = 0.1 * jax.random.normal(ks[4], (Cmid,), jnp.float32)
    w3 = 0.1 * jax.random.normal(ks[5], (Cout, Cmid, 1, 1), jnp.float32)
    b3 = 0.1 * jax.random.normal(ks[6], (Cout,), jnp.float32)

    params = ((w1, b1, make_bn(ks[7], Cmid)),
              (w2, b2, make_bn(ks[8], Cmid)),
              (w3, b3, make_bn(ks[9], Cout)))

    out = bottleneck_forward(x, params)
    out = jax.block_until_ready(out)

    ref = _ref_forward(x, params)
    assert out.shape == (N, Cout, H, W)
    assert jnp.allclose(out, ref, atol=1e-2, rtol=1e-2), "mismatch vs JAX reference"

    print("KERNEL_OK")
</pallas_src>

<mosaic_0001>
module attributes {stable_mosaic.version = 11 : i64} {
  func.func @_bottleneck_kernel(%arg0: i32, %arg1: memref<16x512xf32, #tpu.memory_space<vmem>>, %arg2: memref<512x128xf32, #tpu.memory_space<vmem>>, %arg3: memref<1x128xf32, #tpu.memory_space<vmem>>, %arg4: memref<3x128x128xf32, #tpu.memory_space<vmem>>, %arg5: memref<1x128xf32, #tpu.memory_space<vmem>>, %arg6: memref<128x512xf32, #tpu.memory_space<vmem>>, %arg7: memref<1x512xf32, #tpu.memory_space<vmem>>, %arg8: memref<16x512xf32, #tpu.memory_space<vmem>>) attributes {dimension_semantics = [#tpu.dimension_semantics<parallel>], iteration_bounds = array<i64: 2>, scalar_prefetch = 0 : i64, scratch_operands = 0 : i64, tpu.core_type = #tpu.core_type<tc>, window_params = [{transform_indices = @transform_0, window_bounds = array<i64: 16, 512>}, {pipeline_mode = #tpu.pipeline_mode<synchronous>, transform_indices = @transform_1, window_bounds = array<i64: 512, 128>}, {pipeline_mode = #tpu.pipeline_mode<synchronous>, transform_indices = @transform_2, window_bounds = array<i64: 1, 128>}, {pipeline_mode = #tpu.pipeline_mode<synchronous>, transform_indices = @transform_3, window_bounds = array<i64: 3, 128, 128>}, {pipeline_mode = #tpu.pipeline_mode<synchronous>, transform_indices = @transform_4, window_bounds = array<i64: 1, 128>}, {pipeline_mode = #tpu.pipeline_mode<synchronous>, transform_indices = @transform_5, window_bounds = array<i64: 128, 512>}, {pipeline_mode = #tpu.pipeline_mode<synchronous>, transform_indices = @transform_6, window_bounds = array<i64: 1, 512>}, {transform_indices = @transform_7, window_bounds = array<i64: 16, 512>}]} {
    %c0 = arith.constant 0 : index
    %c0_0 = arith.constant 0 : index
    %0 = vector.load %arg1[%c0, %c0_0] : memref<16x512xf32, #tpu.memory_space<vmem>>, vector<16x512xf32>
    %c0_1 = arith.constant 0 : index
    %c0_2 = arith.constant 0 : index
    %1 = vector.load %arg2[%c0_1, %c0_2] : memref<512x128xf32, #tpu.memory_space<vmem>>, vector<512x128xf32>
    %cst = arith.constant dense<0.000000e+00> : vector<16x128xf32>
    %2 = tpu.matmul %0, %1, %cst {dimension_numbers = #tpu.dot_dimension_numbers<[1], [0], [0], [1], [0, 0, 1, 1], [], []>} : vector<16x512xf32>, vector<512x128xf32>, vector<16x128xf32> -> vector<16x128xf32>
    %c0_3 = arith.constant 0 : index
    %c0_4 = arith.constant 0 : index
    %3 = vector.load %arg3[%c0_3, %c0_4] : memref<1x128xf32, #tpu.memory_space<vmem>>, vector<1x128xf32>
    %4 = vector.broadcast %3 : vector<1x128xf32> to vector<16x128xf32>
    %5 = arith.addf %2, %4 : vector<16x128xf32>
    %cst_5 = arith.constant 0.000000e+00 : f32
    %6 = vector.broadcast %cst_5 : f32 to vector<16x128xf32>
    %7 = arith.maximumf %5, %6 : vector<16x128xf32>
    %cst_6 = arith.constant 0.000000e+00 : f32
    %8 = vector.broadcast %cst_6 : f32 to vector<1x128xf32>
    %9 = vector.extract_strided_slice %7 {offsets = [0, 0], sizes = [15, 128], strides = [1, 1]} : vector<16x128xf32> to vector<15x128xf32>
    %10 = tpu.concatenate %8, %9 in 0 : vector<1x128xf32>, vector<15x128xf32> -> vector<16x128xf32>
    %11 = vector.extract_strided_slice %7 {offsets = [1, 0], sizes = [15, 128], strides = [1, 1]} : vector<16x128xf32> to vector<15x128xf32>
    %12 = tpu.concatenate %11, %8 in 0 : vector<15x128xf32>, vector<1x128xf32> -> vector<16x128xf32>
    %c0_7 = arith.constant 0 : index
    %c0_8 = arith.constant 0 : index
    %c0_9 = arith.constant 0 : index
    %13 = vector.load %arg4[%c0_7, %c0_8, %c0_9] : memref<3x128x128xf32, #tpu.memory_space<vmem>>, vector<1x128x128xf32>
    %14 = vector.shape_cast %13 : vector<1x128x128xf32> to vector<128x128xf32>
    %cst_10 = arith.constant dense<0.000000e+00> : vector<16x128xf32>
    %15 = tpu.matmul %10, %14, %cst_10 {dimension_numbers = #tpu.dot_dimension_numbers<[1], [0], [0], [1], [0, 0, 1, 1], [], []>} : vector<16x128xf32>, vector<128x128xf32>, vector<16x128xf32> -> vector<16x128xf32>
    %c1 = arith.constant 1 : index
    %c0_11 = arith.constant 0 : index
    %c0_12 = arith.constant 0 : index
    %16 = vector.load %arg4[%c1, %c0_11, %c0_12] : memref<3x128x128xf32, #tpu.memory_space<vmem>>, vector<1x128x128xf32>
    %17 = vector.shape_cast %16 : vector<1x128x128xf32> to vector<128x128xf32>
    %cst_13 = arith.constant dense<0.000000e+00> : vector<16x128xf32>
    %18 = tpu.matmul %7, %17, %cst_13 {dimension_numbers = #tpu.dot_dimension_numbers<[1], [0], [0], [1], [0, 0, 1, 1], [], []>} : vector<16x128xf32>, vector<128x128xf32>, vector<16x128xf32> -> vector<16x128xf32>
    %19 = arith.addf %15, %18 : vector<16x128xf32>
    %c2 = arith.constant 2 : index
    %c0_14 = arith.constant 0 : index
    %c0_15 = arith.constant 0 : index
    %20 = vector.load %arg4[%c2, %c0_14, %c0_15] : memref<3x128x128xf32, #tpu.memory_space<vmem>>, vector<1x128x128xf32>
    %21 = vector.shape_cast %20 : vector<1x128x128xf32> to vector<128x128xf32>
    %cst_16 = arith.constant dense<0.000000e+00> : vector<16x128xf32>
    %22 = tpu.matmul %12, %21, %cst_16 {dimension_numbers = #tpu.dot_dimension_numbers<[1], [0], [0], [1], [0, 0, 1, 1], [], []>} : vector<16x128xf32>, vector<128x128xf32>, vector<16x128xf32> -> vector<16x128xf32>
    %23 = arith.addf %19, %22 : vector<16x128xf32>
    %c0_17 = arith.constant 0 : index
    %c0_18 = arith.constant 0 : index
    %24 = vector.load %arg5[%c0_17, %c0_18] : memref<1x128xf32, #tpu.memory_space<vmem>>, vector<1x128xf32>
    %25 = vector.broadcast %24 : vector<1x128xf32> to vector<16x128xf32>
    %26 = arith.addf %23, %25 : vector<16x128xf32>
    %cst_19 = arith.constant 0.000000e+00 : f32
    %27 = vector.broadcast %cst_19 : f32 to vector<16x128xf32>
    %28 = arith.maximumf %26, %27 : vector<16x128xf32>
    %c0_20 = arith.constant 0 : index
    %c0_21 = arith.constant 0 : index
    %29 = vector.load %arg6[%c0_20, %c0_21] : memref<128x512xf32, #tpu.memory_space<vmem>>, vector<128x512xf32>
    %cst_22 = arith.constant dense<0.000000e+00> : vector<16x512xf32>
    %30 = tpu.matmul %28, %29, %cst_22 {dimension_numbers = #tpu.dot_dimension_numbers<[1], [0], [0], [1], [0, 0, 1, 1], [], []>} : vector<16x128xf32>, vector<128x512xf32>, vector<16x512xf32> -> vector<16x512xf32>
    %c0_23 = arith.constant 0 : index
    %c0_24 = arith.constant 0 : index
    %31 = vector.load %arg7[%c0_23, %c0_24] : memref<1x512xf32, #tpu.memory_space<vmem>>, vector<1x512xf32>
    %32 = vector.broadcast %31 : vector<1x512xf32> to vector<16x512xf32>
    %33 = arith.addf %30, %32 : vector<16x512xf32>
    %34 = arith.addf %33, %0 : vector<16x512xf32>
    %cst_25 = arith.constant 0.000000e+00 : f32
    %35 = vector.broadcast %cst_25 : f32 to vector<16x512xf32>
    %36 = arith.maximumf %34, %35 : vector<16x512xf32>
    %c0_26 = arith.constant 0 : index
    %c0_27 = arith.constant 0 : index
    %37 = vector.load %arg8[%c0_26, %c0_27] : memref<16x512xf32, #tpu.memory_space<vmem>>, vector<16x512xf32>
    tpu.vector_store %arg8[%c0_26, %c0_27], %36 {strides = array<i32>} : memref<16x512xf32, #tpu.memory_space<vmem>>, vector<16x512xf32>,
    return
  }
  func.func @transform_0(%arg0: i32) -> (i32, i32) {
    %c0_i32 = arith.constant 0 : i32
    %c0_i32_0 = arith.constant 0 : i32
    return %arg0, %c0_i32 : i32, i32
  }
  func.func @transform_1(%arg0: i32) -> (i32, i32) {
    %c0_i32 = arith.constant 0 : i32
    %c0_i32_0 = arith.constant 0 : i32
    %c0_i32_1 = arith.constant 0 : i32
    return %c0_i32, %c0_i32_0 : i32, i32
  }
  func.func @transform_2(%arg0: i32) -> (i32, i32) {
    %c0_i32 = arith.constant 0 : i32
    %c0_i32_0 = arith.constant 0 : i32
    %c0_i32_1 = arith.constant 0 : i32
    return %c0_i32, %c0_i32_0 : i32, i32
  }
  func.func @transform_3(%arg0: i32) -> (i32, i32, i32) {
    %c0_i32 = arith.constant 0 : i32
    %c0_i32_0 = arith.constant 0 : i32
    %c0_i32_1 = arith.constant 0 : i32
    %c0_i32_2 = arith.constant 0 : i32
    return %c0_i32, %c0_i32_0, %c0_i32_1 : i32, i32, i32
  }
  func.func @transform_4(%arg0: i32) -> (i32, i32) {
    %c0_i32 = arith.constant 0 : i32
    %c0_i32_0 = arith.constant 0 : i32
    %c0_i32_1 = arith.constant 0 : i32
    return %c0_i32, %c0_i32_0 : i32, i32
  }
  func.func @transform_5(%arg0: i32) -> (i32, i32) {
    %c0_i32 = arith.constant 0 : i32
    %c0_i32_0 = arith.constant 0 : i32
    %c0_i32_1 = arith.constant 0 : i32
    return %c0_i32, %c0_i32_0 : i32, i32
  }
  func.func @transform_6(%arg0: i32) -> (i32, i32) {
    %c0_i32 = arith.constant 0 : i32
    %c0_i32_0 = arith.constant 0 : i32
    %c0_i32_1 = arith.constant 0 : i32
    return %c0_i32, %c0_i32_0 : i32, i32
  }
  func.func @transform_7(%arg0: i32) -> (i32, i32) {
    %c0_i32 = arith.constant 0 : i32
    %c0_i32_0 = arith.constant 0 : i32
    return %arg0, %c0_i32 : i32, i32
  }
}

</mosaic_0001>

<bundles_post_ra>
// kernel: tpu_custom_call.1
= control target key start
LH: loop header
LB: loop body
LE: loop exit
PB: predicated region body
PF: predicated region fallthrough
CT: control target
= control target key end

     0   :  { %12 = vsyncpa [#allocation3], 0  ;;  %s2438_s0 = inlined_call_operand.hbm [shape: f32[32,512], index: 0, kind: input, shape index: {}]   ;;  %s2439_s1 = inlined_call_operand.hbm [shape: f32[512,128], index: 1, kind: input, shape index: {}]   ;;  %s2440_s2 = inlined_call_operand.vmem [shape: f32[1,128], index: 2, kind: input, shape index: {}]   ;;  %s2441_s3 = inlined_call_operand.hbm [shape: f32[3,128,128], index: 3, kind: input, shape index: {}]   ;;  %s2442_s4 = inlined_call_operand.vmem [shape: f32[1,128], index: 4, kind: input, shape index: {}]   ;;  %s2443_s5 = inlined_call_operand.hbm [shape: f32[128,512], index: 5, kind: input, shape index: {}]   ;;  %s2444_s6 = inlined_call_operand.vmem [shape: f32[1,512], index: 6, kind: input, shape index: {}]   ;;  %s2445_s7 = inlined_call_operand.hbm [shape: f32[32,512], index: 7, kind: output, shape index: {}]  }
   0x1   :  { %14 = vsyncpa [#allocation3 + $0x1], 0 }
   0x2   :  { %15 = vsyncpa [#allocation6], 0 }
   0x3   :  { %16 = vsyncpa [#allocation9], 0 }
   0x4   :  { %17 = vsyncpa [#allocation4], 0 }
   0x5   :  { %19 = vsyncpa [#allocation4 + $0x1], 0  ;;  %s2080_s24 = smov 0   ;;  %s2082_s25 = smov 0  }
   0x6   :  { %s2084_s26 = smov 0   ;;  %s2086_s27 = smov 0  }
   0x7 LB: > { %s2101_s28 = sadd.s32 4294967295, %s2026_s27   ;;  %s1260_s29 = sadd.s32 4294967294, %s2026_s27   ;;  %s2026_s27 = sphi %s2086_s27, %s2471_s27   ;;  %s2022_s26 = sphi %s2084_s26, %s2470_s26   ;;  %s2018_s25 = sphi %s2082_s25, %s2469_s25   ;;  %s2014_s24 = sphi %s2080_s24, %s2468_s24  }
   0x8   : > { %p45_p0 = scmp.ne.s32.totalorder %s2018_s25, %s2014_s24  ;;  %p2446_p1 = scmp.eq.s32.totalorder %s2101_s28, 0 }
   0x9   : > { %p201_p3 = scmp.eq.s32.totalorder %s1260_s29, 1  ;;  %p1261_p5 = scmp.ge.s32.totalorder %s2026_s27, 1 }
   0xa   : > { %p2110_p4 = por %p2446_p1, %p45_p0  ;;  %p208_p7 = scmp.lt.s32.totalorder %s2026_s27, 3 }
   0xb   : > { %p2115_p6 = por %p201_p3, %p45_p0  ;;  %s2028_s10 = smov [#allocation5]  }
   0xc   : > { %s2450_s30 = scalar_select %p2110_p4, 1, 0 }
   0xd   : > { %s2451_s8 = scalar_select %p2115_p6, 1, 0 }
   0xe   : > { %p2120_p8 = pnand %p1261_p5, %p208_p7  ;;  %s220_s11 = sshll.u32 %s2028_s10, 4  ;;  %s2124_s11 = int_to_ptr.vmem [resolvable:$true] %s220_s11 }
   0xf   : > { %2452 = sst [smem:[#allocation15_spill]] %s2451_s8  ;;  %s2029_s13 = smov [#allocation7]  }
  0x10   : > { %s2453_s9 = scalar_select %p2120_p8, 1, 0 }
  0x11   : > { %p1770_p9 = pneg %p2120_p8  ;;  %s236_s14 = sshll.u32 %s2029_s13, 4  ;;  %s2135_s14 = int_to_ptr.vmem [resolvable:$true] %s236_s14 }
  0x12   : > { %s2030_s15 = smov [#allocation8]   ;;  %s1838_s19 = scalar_lea.hbm %s2439_s1, 8192 }
  0x13   : > { %p2131_p11 = pnand %p1770_p9, %p2446_p1  ;;  %s2137_s16 = sshll.u32 %s2030_s15, 4  ;;  %s253_s16 = int_to_ptr.vmem [resolvable:$true] %s2137_s16 }
  0x14   : > { %p1839_p12 = scmp.ne.s32.totalorder %s2439_s1, %s1838_s19  ;;  %p1845_p5 = scmp.lt.u32.totalorder %s1838_s19, %s2439_s1 }
  0x15   : > { %p2147_p13 = pneg %p2131_p11 }
  0x17   : > { %p1841_p0 = pnand %p2147_p13, %p1839_p12 }
  0x19   : > { %p1842_p3 = pneg %p1841_p0 }
  0x1b   : > { %p1847_p7 = pnand %p1845_p5, %p1842_p3 }
  0x1d   : > { %1850 = shalt.err (!%p1847_p7)
}
  0x1e   : > { %s1851_s10 = scalar_lea.vmem %s2124_s11, 8192  ;;  %p1859_p2 = scmp.lt.s32.totalorder %s2124_s11, %s2124_s11 }
  0x1f   : > { %p1852_p9 = scmp.ne.s32.totalorder %s2124_s11, %s1851_s10  ;;  %p1860_p6 = scmp.lt.s32.totalorder %s1851_s10, %s1851_s10 }
  0x21   : > { %p1854_p10 = pnand %p1852_p9, %p2147_p13  ;;  %p1861_p12 = por %p1860_p6, %p1859_p2 }
  0x23   : > { %p1855_p1 = pneg %p1854_p10 }
  0x25   : > { %p1862_p0 = pnand %p1861_p12, %p1855_p1 }
  0x27   : > { %1865 = shalt.err (!%p1862_p0)
}
  0x28   : > { %s2031_s13 = smov 128   ;;  %s2032_s15 = smov 8  }
  0x29   : > { %1773 = dma.hbm_to_vmem [thread:$0]  (!%p2131_p11), %s2439_s1, 8192, %s2124_s11, [#allocation6], %s2031_s13, %s2031_s13, %s2032_s15  }
  0x2a   : > { %s1866_s21 = scalar_lea.hbm %s2441_s3, 6144 }
  0x2b   : > { %p1867_p2 = scmp.ne.s32.totalorder %s2441_s3, %s1866_s21  ;;  %p1873_p10 = scmp.lt.u32.totalorder %s1866_s21, %s2441_s3 }
  0x2d   : > { %p1869_p1 = pnand %p1867_p2, %p2147_p13 }
  0x2f   : > { %p1870_p6 = pneg %p1869_p1 }
  0x31   : > { %p1875_p3 = pnand %p1873_p10, %p1870_p6 }
  0x33   : > { %1878 = shalt.err (!%p1875_p3)
}
  0x34   : > { %s1879_s11 = scalar_lea.vmem %s2135_s14, 6144  ;;  %p1887_p12 = scmp.lt.s32.totalorder %s2135_s14, %s2135_s14 }
  0x35   : > { %p1880_p5 = scmp.ne.s32.totalorder %s2135_s14, %s1879_s11  ;;  %p1888_p0 = scmp.lt.s32.totalorder %s1879_s11, %s1879_s11 }
  0x37   : > { %p1882_p7 = pnand %p1880_p5, %p2147_p13  ;;  %p1889_p2 = por %p1888_p0, %p1887_p12 }
  0x39   : > { %p1883_p9 = pneg %p1882_p7 }
  0x3b   : > { %p1890_p1 = pnand %p1889_p2, %p1883_p9 }
  0x3d   : > { %1893 = shalt.err (!%p1890_p1)
}
  0x3e   : > { %1776 = dma.hbm_to_vmem [thread:$0]  (!%p2131_p11), %s2441_s3, 6144, %s2135_s14, [#allocation6], %s2031_s13, %s2031_s13, %s2032_s15  }
  0x3f   : > { %s1894_s20 = scalar_lea.hbm %s2443_s5, 8192 }
  0x40   : > { %p1895_p6 = scmp.ne.s32.totalorder %s2443_s5, %s1894_s20  ;;  %p1901_p5 = scmp.lt.u32.totalorder %s1894_s20, %s2443_s5 }
  0x42   : > { %p1897_p10 = pnand %p1895_p6, %p2147_p13 }
  0x44   : > { %p1898_p3 = pneg %p1897_p10 }
  0x46   : > { %p1903_p7 = pnand %p1901_p5, %p1898_p3 }
  0x48   : > { %1906 = shalt.err (!%p1903_p7)
}
  0x49   : > { %s1907_s11 = scalar_lea.vmem %s253_s16, 8192  ;;  %p1915_p2 = scmp.lt.s32.totalorder %s253_s16, %s253_s16 }
  0x4a   : > { %p1908_p9 = scmp.ne.s32.totalorder %s253_s16, %s1907_s11  ;;  %p1916_p1 = scmp.lt.s32.totalorder %s1907_s11, %s1907_s11 }
  0x4c   : > { %p1910_p12 = pnand %p1908_p9, %p2147_p13  ;;  %p1917_p4 = por %p1916_p1, %p1915_p2 }
  0x4e   : > { %p1911_p0 = pneg %p1910_p12 }
  0x50   : > { %p1918_p8 = pnand %p1917_p4, %p1911_p0 }
  0x52   : > { %1921 = shalt.err (!%p1918_p8)
}
  0x53   : > { %s2033_s14 = smov 512   ;;  %s2034_s22 = smov 32  }
  0x54   : > { %1779 = dma.hbm_to_vmem [thread:$0]  (!%p2131_p11), %s2443_s5, 8192, %s253_s16, [#allocation9], %s2033_s14, %s2033_s14, %s2034_s22  }
  0x55   : > { %s2214_s8 = sadd.s32 1, %s2026_s27   ;;  %s32_s18 = sadd.s32 1, %s2022_s26 }
  0x56   : > { %s29_s17 = ssub.s32 %s2026_s27, %s2214_s8  ;;  %p39_p8 = scmp.ne.s32.totalorder %s2022_s26, %s2018_s25 }
  0x57   : > { %p30_p4 = scmp.eq.s32.totalorder %s29_s17, 0  ;;  %p40_p13 = scmp.eq.s32.totalorder %s2026_s27, 0 }
  0x58   : > { %p1791_p6 = scmp.lt.s32.totalorder %s2026_s27, 2  ;;  %p2456_p3 = scmp.eq.s32.totalorder %s2101_s28, 1 }
  0x59   : > { %s2224_s19 = scalar_select %p30_p4, %s2022_s26, %s32_s18  }
  0x5a   : > { %p41_p10 = por %p40_p13, %p39_p8  ;;  %p2228_p5 = por %p2456_p3, %p39_p8 }
  0x5b   : > { %s269_s20 = sand.u32 1, %s2022_s26   ;;  %s1288_s21 = sshll.u32 %s2026_s27, 10 }
  0x5c   : > { %s1266_s16 = sshll.u32 %s269_s20, 6  ;;  %s2237_s10 = scalar_lea.hbm %s2438_s0, %s1288_s21 }
  0x5d   : > { %s273_s11 = scalar_lea.vmem [#allocation2], %s1266_s16  ;;  %p2239_p11 = pnand %p1791_p6, %p41_p10 }
  0x5e   : > { %s281_s13 = sshll.u32 %s273_s11, 4  ;;  %s2245_s17 = scalar_lea.sflag [#allocation3], %s269_s20  ;;  %s2243_s13 = int_to_ptr.vmem [resolvable:$true] %s281_s13 }
  0x5f   : > { %s1922_s18 = scalar_lea.hbm %s2237_s10, 1024  ;;  %p1924_p9 = pneg %p2239_p11 }
  0x60   : > { %p1923_p7 = scmp.ne.s32.totalorder %s2237_s10, %s1922_s18  ;;  %s1927_s23 = scalar_lea.hbm %s2438_s0, 2048 }
  0x61   : > { %p1928_p2 = scmp.lt.u32.totalorder %s2237_s10, %s2438_s0  ;;  %p1929_p1 = scmp.lt.u32.totalorder %s1927_s23, %s1922_s18 }
  0x62   : > { %p1925_p12 = pnand %p1924_p9, %p1923_p7  ;;  %p1931_p8 = scmp.lt.u32.totalorder %s1922_s18, %s2237_s10 }
  0x63   : > { %p1930_p4 = por %p1929_p1, %p1928_p2 }
  0x64   : > { %p1926_p0 = pneg %p1925_p12 }
  0x65   : > { %p1932_p13 = por %p1931_p8, %p1930_p4 }
  0x67   : > { %p1933_p6 = pnand %p1932_p13, %p1926_p0 }
  0x69   : > { %1936 = shalt.err (!%p1933_p6)
}
  0x6a   : > { %s1937_s20 = scalar_lea.vmem %s2243_s13, 1024  ;;  %s2035_s21 = smov [#allocation2]  }
  0x6b   : > { %p1938_p10 = scmp.ne.s32.totalorder %s2243_s13, %s1937_s20  ;;  %s1942_s16 = sshll.u32 %s2035_s21, 4  ;;  %s1943_s16 = int_to_ptr.vmem [resolvable:$false] %s1942_s16 }
  0x6c   : > { %s1944_s29 = scalar_lea.vmem %s1943_s16, 2048  ;;  %p1945_p12 = scmp.lt.s32.totalorder %s2243_s13, %s1943_s16 }
  0x6d   : > { %p1940_p3 = pnand %p1938_p10, %p1924_p9  ;;  %p1946_p2 = scmp.lt.s32.totalorder %s1944_s29, %s1937_s20 }
  0x6f   : > { %p1941_p7 = pneg %p1940_p3  ;;  %p1947_p1 = por %p1946_p2, %p1945_p12 }
  0x71   : > { %p1948_p4 = pnand %p1947_p1, %p1941_p7 }
  0x73   : > { %1951 = shalt.err (!%p1948_p4)
}
  0x74   : > { %1783 = dma.hbm_to_vmem [thread:$0]  (!%p2239_p11), %s2237_s10, 1024, %s2243_s13, %s2245_s17, %s2033_s14, %s2033_s14, %s2034_s22  }
  0x75   : > { %p2459_p9 = scmp.ne.s32.totalorder %s2453_s9, 0 }
  0x76   : > { %s2279_s18 = sand.u32 (!%p2459_p9), 1, %s2018_s25   ;;  %p2460_p0 = scmp.ne.s32.totalorder (!%p2459_p9), %s2450_s30, 0 }
  0x77   : > { %293 = sbr.rel (%p2459_p9) target bundleno = 945 (0x3b1), region = 48  ;;  %s1271_s23 = sshll.u32 (!%p2459_p9), %s2279_s18, 6 }
  0x78   : > { %s296_s11 = scalar_lea.sflag (!%p2459_p9), [#allocation3], %s2279_s18  ;;  %s2285_s15 = scalar_lea.vmem (!%p2459_p9), [#allocation2], %s1271_s23 }
  0x7e   : > { %1997 = dma.done.wait (%p2460_p0), %s296_s11, 1024  }
  0x7f   : > { %1999 = vsyncadd (%p2460_p0), %s296_s11, 4294966272  ;;  %p2461_p11 = scmp.eq.s32.totalorder %s2101_s28, 0 }
  0x81   : > { %2001 = dma.done.wait (%p2461_p11), [#allocation6], 14336   ;;  %p2462_p8 = pmov %p2461_p11 }
  0x83   : > { %2003 = vsyncadd (%p2462_p8), [#allocation6], 4294952960  ;;  %p2463_p13 = pmov %p2462_p8 }
  0x84   : > { %p2464_p6 = pmov %p2462_p8 }
  0x85   : > { %2005 = dma.done.wait (%p2463_p13), [#allocation9], 8192  }
  0x86   : > { %2007 = vsyncadd (%p2464_p6), [#allocation9], 4294959104  ;;  %v368_v0 = vld [vmem:[#allocation5 + $0x80] sm:$0xff]  ;;  %v369_v1 = vld [vmem:[#allocation5 + $0x88] sm:$0xff]  ;;  %vm577_vm0 = vcmask 1040384   ;;  %vm584_vm2 = vcmask 1046528  }
  0x87   : > { %v352_v2 = vld [vmem:[#allocation5] sm:$0xff]  ;;  %v1526_v3 = vpack.c.bf16 %v369_v1, %v368_v0  ;;  %v353_v4 = vld [vmem:[#allocation5 + $0x8] sm:$0xff]  ;;  %v370_v11 = vld [vmem:[#allocation5 + $0x90] sm:$0xff]  ;;  %s2371_s17 = scalar_lea.vmem [#allocation10], %s1271_s23  ;;  %s1290_s21 = sshll.u32 %s2101_s28, 10 }
  0x88   : > { %v400_v5 = vld [vmem:[#allocation5 + $0x180] sm:$0xff]  ;;  %v401_v6 = vld [vmem:[#allocation5 + $0x188] sm:$0xff]  ;;  %v1528_v7 = vpack.c.bf16 %v353_v4, %v352_v2  ;;  %v371_v13 = vld [vmem:[#allocation5 + $0x98] sm:$0xff]  ;;  %s1158_s20 = sshll.u32 %s2371_s17, 4  ;;  %s2392_s23 = scalar_lea.hbm %s2445_s7, %s1290_s21  ;;  %s2385_s20 = int_to_ptr.vmem [resolvable:$true] %s1158_s20 }
  0x89   : > { %v1558_v8 = vpack.c.bf16 %v401_v6, %v400_v5  ;;  %v384_v9 = vld [vmem:[#allocation5 + $0x100] sm:$0xff]  ;;  %v385_v10 = vld [vmem:[#allocation5 + $0x108] sm:$0xff]  ;;  %1527 = vmatprep.subr.bf16.mxu0 %v1526_v3  ;;  %v354_v14 = vld [vmem:[#allocation5 + $0x10] sm:$0xff]  ;;  %v1530_v16 = vpack.c.bf16 %v371_v13, %v370_v11  ;;  %s1144_s28 = scalar_lea.sflag [#allocation4], %s2279_s18  ;;  %s1952_s11 = scalar_lea.vmem %s2385_s20, 1024 }
  0x8a   : > { %v1560_v12 = vpack.c.bf16 %v385_v10, %v384_v9  ;;  %v355_v15 = vld [vmem:[#allocation5 + $0x18] sm:$0xff]  ;;  %1529 = vmatpush3.bf16.msra.mxu0 %v1528_v7  ;;  %v402_v18 = vld [vmem:[#allocation5 + $0x190] sm:$0xff]  ;;  %v372_v23 = vld [vmem:[#allocation5 + $0xa0] sm:$0xff]  ;;  %p1953_p10 = scmp.ne.s32.totalorder %s2385_s20, %s1952_s11 }
  0x8b   : > { %1559 = vmatprep.subr.bf16.mxu1 %v1558_v8  ;;  %v1532_v17 = vpack.c.bf16 %v355_v15, %v354_v14  ;;  %v403_v19 = vld [vmem:[#allocation5 + $0x198] sm:$0xff]  ;;  %v386_v20 = vld [vmem:[#allocation5 + $0x110] sm:$0xff]  ;;  %v373_v24 = vld [vmem:[#allocation5 + $0xa8] sm:$0xff]  ;;  %1531 = vmatprep.subr.bf16.mxu0 %v1530_v16 }
  0x8c   : > { %1561 = vmatpush3.bf16.msra.mxu1 %v1560_v12  ;;  %v1562_v21 = vpack.c.bf16 %v403_v19, %v402_v18  ;;  %v387_v22 = vld [vmem:[#allocation5 + $0x118] sm:$0xff]  ;;  %v1534_v26 = vpack.c.bf16 %v373_v24, %v372_v23  ;;  %v356_v27 = vld [vmem:[#allocation5 + $0x20] sm:$0xff]  ;;  %v357_v28 = vld [vmem:[#allocation5 + $0x28] sm:$0xff]  ;;  %p1954_p3 = pnand %p1953_p10, %p2228_p5 }
  0x8d   : > { %v1564_v25 = vpack.c.bf16 %v387_v22, %v386_v20  ;;  %v404_v29 = vld [vmem:[#allocation5 + $0x1a0] sm:$0xff]  ;;  %v405_v30 = vld [vmem:[#allocation5 + $0x1a8] sm:$0xff]  ;;  %v1536_v33 = vpack.c.bf16 %v357_v28, %v356_v27  ;;  %v374_v35 = vld [vmem:[#allocation5 + $0xb0] sm:$0xff] }
  0x8e   : > { %1563 = vmatprep.subr.bf16.mxu1 %v1562_v21  ;;  %v388_v31 = vld [vmem:[#allocation5 + $0x120] sm:$0xff]  ;;  %v389_v32 = vld [vmem:[#allocation5 + $0x128] sm:$0xff]  ;;  %1533 = vmatpush3.bf16.msra.mxu0 %v1532_v17  ;;  %v1566_v34 = vpack.c.bf16 %v405_v30, %v404_v29  ;;  %v375_v36 = vld [vmem:[#allocation5 + $0xb8] sm:$0xff]  ;;  %p1955_p7 = pneg %p1954_p3 }
  0x8f   : > { %v358_v37 = vld [vmem:[#allocation5 + $0x30] sm:$0xff]  ;;  %1535 = vmatprep.subr.bf16.mxu0 %v1534_v26  ;;  %v1568_v38 = vpack.c.bf16 %v389_v32, %v388_v31  ;;  %v1538_v39 = vpack.c.bf16 %v375_v36, %v374_v35  ;;  %v359_v40 = vld [vmem:[#allocation5 + $0x38] sm:$0xff]  ;;  %v376_v46 = vld [vmem:[#allocation5 + $0xc0] sm:$0xff] }
  0x90   : > { %1565 = vmatpush3.bf16.msra.mxu1 %v1564_v25  ;;  %v406_v41 = vld [vmem:[#allocation5 + $0x1b0] sm:$0xff]  ;;  %v407_v42 = vld [vmem:[#allocation5 + $0x1b8] sm:$0xff]  ;;  %v377_v47 = vld [vmem:[#allocation5 + $0xc8] sm:$0xff]  ;;  %v1540_v48 = vpack.c.bf16 %v359_v40, %v358_v37 }
  0x91   : > { %1567 = vmatprep.subr.bf16.mxu1 %v1566_v34  ;;  %v1570_v43 = vpack.c.bf16 %v407_v42, %v406_v41  ;;  %v390_v44 = vld [vmem:[#allocation5 + $0x130] sm:$0xff]  ;;  %v391_v45 = vld [vmem:[#allocation5 + $0x138] sm:$0xff]  ;;  %v408_v49 = vld [vmem:[#allocation5 + $0x1c0] sm:$0xff]  ;;  %v1542_v52 = vpack.c.bf16 %v377_v47, %v376_v46 }
  0x92   : > { %1537 = vmatpush3.bf16.msra.mxu0 %v1536_v33  ;;  %v409_v50 = vld [vmem:[#allocation5 + $0x1c8] sm:$0xff]  ;;  %v1572_v51 = vpack.c.bf16 %v391_v45, %v390_v44  ;;  %v360_v53 = vld [vmem:[#allocation5 + $0x40] sm:$0xff]  ;;  %v378_v58 = vld [vmem:[#allocation5 + $0xd0] sm:$0xff] }
  0x93   : > { %1539 = vmatprep.subr.bf16.mxu0 %v1538_v39  ;;  %v361_v54 = vld [vmem:[#allocation5 + $0x48] sm:$0xff]  ;;  %v392_v55 = vld [vmem:[#allocation5 + $0x140] sm:$0xff]  ;;  %v1574_v56 = vpack.c.bf16 %v409_v50, %v408_v49  ;;  %v379_v59 = vld [vmem:[#allocation5 + $0xd8] sm:$0xff] }
  0x94   : > { %1569 = vmatpush3.bf16.msra.mxu1 %v1568_v38  ;;  %v393_v57 = vld [vmem:[#allocation5 + $0x148] sm:$0xff]  ;;  %v410_v60 = vld [vmem:[#allocation5 + $0x1d0] sm:$0xff]  ;;  %v411_v61 = vld [vmem:[#allocation5 + $0x1d8] sm:$0xff]  ;;  %v1544_v62 = vpack.c.bf16 %v361_v54, %v360_v53  ;;  %v1546_v0 = vpack.c.bf16 %v379_v59, %v378_v58 }
  0x95   : > { %1571 = vmatprep.subr.bf16.mxu1 %v1570_v43  ;;  %v1576_v63 = vpack.c.bf16 %v393_v57, %v392_v55  ;;  %v362_v1 = vld [vmem:[#allocation5 + $0x50] sm:$0xff]  ;;  %v363_v2 = vld [vmem:[#allocation5 + $0x58] sm:$0xff]  ;;  %v1578_v4 = vpack.c.bf16 %v411_v61, %v410_v60  ;;  %v380_v6 = vld [vmem:[#allocation5 + $0xe0] sm:$0xff] }
  0x96   : > { %1541 = vmatpush3.bf16.msra.mxu0 %v1540_v48  ;;  %v394_v3 = vld [vmem:[#allocation5 + $0x150] sm:$0xff]  ;;  %v395_v5 = vld [vmem:[#allocation5 + $0x158] sm:$0xff]  ;;  %v381_v7 = vld [vmem:[#allocation5 + $0xe8] sm:$0xff]  ;;  %v1548_v10 = vpack.c.bf16 %v363_v2, %v362_v1 }
  0x97   : > { %1543 = vmatprep.subr.bf16.mxu0 %v1542_v52  ;;  %v412_v8 = vld [vmem:[#allocation5 + $0x1e0] sm:$0xff]  ;;  %v413_v9 = vld [vmem:[#allocation5 + $0x1e8] sm:$0xff]  ;;  %v1580_v13 = vpack.c.bf16 %v395_v5, %v394_v3  ;;  %v1550_v14 = vpack.c.bf16 %v381_v7, %v380_v6  ;;  %v382_v19 = vld [vmem:[#allocation5 + $0xf0] sm:$0xff] }
  0x98   : > { %1573 = vmatpush3.bf16.msra.mxu1 %v1572_v51  ;;  %v364_v11 = vld [vmem:[#allocation5 + $0x60] sm:$0xff]  ;;  %v365_v12 = vld [vmem:[#allocation5 + $0x68] sm:$0xff]  ;;  %v1582_v18 = vpack.c.bf16 %v413_v9, %v412_v8  ;;  %v383_v20 = vld [vmem:[#allocation5 + $0xf8] sm:$0xff] }
  0x99   : > { %1575 = vmatprep.subr.bf16.mxu1 %v1574_v56  ;;  %v396_v15 = vld [vmem:[#allocation5 + $0x160] sm:$0xff]  ;;  %v397_v16 = vld [vmem:[#allocation5 + $0x168] sm:$0xff]  ;;  %v2304_v21 = vld [vmem:[%s2285_s15 + $0x18] sm:$0xff]  ;;  %v1552_v24 = vpack.c.bf16 %v365_v12, %v364_v11  ;;  %v1554_v26 = vpack.c.bf16 %v383_v20, %v382_v19 }
  0x9a   : > { %1545 = vmatpush3.bf16.msra.mxu0 %v1544_v62  ;;  %v2300_v17 = vld [vmem:[%s2285_s15 + $0x8] sm:$0xff]  ;;  %v414_v22 = vld [vmem:[#allocation5 + $0x1f0] sm:$0xff]  ;;  %v415_v23 = vld [vmem:[#allocation5 + $0x1f8] sm:$0xff]  ;;  %562 = vmatprep.mubr.f32.mxu1 %v2304_v21  ;;  %v1584_v25 = vpack.c.bf16 %v397_v16, %v396_v15 }
  0x9b   : > { %1547 = vmatprep.subr.bf16.mxu0 %v1546_v0  ;;  %487 = vmatprep.mubr.f32.mxu0 %v2300_v17  ;;  %v366_v27 = vld [vmem:[#allocation5 + $0x70] sm:$0xff]  ;;  %v367_v28 = vld [vmem:[#allocation5 + $0x78] sm:$0xff]  ;;  %v1586_v30 = vpack.c.bf16 %v415_v23, %v414_v22  ;;  %v608_v32 = vld [vmem:[#allocation7 + $0x80] sm:$0xff] }
  0x9c   : > { %1577 = vmatpush3.bf16.msra.mxu1 %v1576_v63  ;;  %v398_v29 = vld [vmem:[#allocation5 + $0x170] sm:$0xff]  ;;  %v399_v31 = vld [vmem:[#allocation5 + $0x178] sm:$0xff]  ;;  %v609_v33 = vld [vmem:[#allocation7 + $0x88] sm:$0xff]  ;;  %v1556_v34 = vpack.c.bf16 %v367_v28, %v366_v27 }
  0x9d   : > { %1579 = vmatprep.subr.bf16.mxu1 %v1578_v4  ;;  %v1588_v35 = vpack.c.bf16 %v399_v31, %v398_v29  ;;  %v1590_v36 = vpack.c.bf16 %v609_v33, %v608_v32  ;;  %v610_v37 = vld [vmem:[#allocation7 + $0x90] sm:$0xff]  ;;  %v611_v38 = vld [vmem:[#allocation7 + $0x98] sm:$0xff]  ;;  %v2308_v39 = vld [vmem:[%s2285_s15] sm:$0xff] }
  0x9e   : > { %1549 = vmatpush3.bf16.msra.mxu0 %v1548_v10  ;;  %v2311_v40 = vld [vmem:[%s2285_s15 + $0x10] sm:$0xff]  ;;  %v2314_v41 = vld [vmem:[%s2285_s15 + $0x28] sm:$0xff]  ;;  %v2317_v42 = vld [vmem:[%s2285_s15 + $0x38] sm:$0xff]  ;;  %v1594_v43 = vpack.c.bf16 %v611_v38, %v610_v37 }
  0x9f   : > { %1551 = vmatprep.subr.bf16.mxu0 %v1550_v14  ;;  %v612_v44 = vld [vmem:[#allocation7 + $0xa0] sm:$0xff]  ;;  %v613_v45 = vld [vmem:[#allocation7 + $0xa8] sm:$0xff]  ;;  %v2327_v47 = vld [vmem:[%s2285_s15 + $0x30] sm:$0xff] }
  0xa0   : > { %1581 = vmatpush3.bf16.msra.mxu1 %v1580_v13  ;;  %v2323_v46 = vld [vmem:[%s2285_s15 + $0x20] sm:$0xff]  ;;  %v1598_v48 = vpack.c.bf16 %v613_v45, %v612_v44  ;;  %v614_v49 = vld [vmem:[#allocation7 + $0xb0] sm:$0xff]  ;;  %v615_v50 = vld [vmem:[#allocation7 + $0xb8] sm:$0xff]  ;;  %s2037_s15 = smov [#allocation10]  }
  0xa1   : > { %1583 = vmatprep.subr.bf16.mxu1 %v1582_v18  ;;  %v1602_v51 = vpack.c.bf16 %v615_v50, %v614_v49  ;;  %v616_v52 = vld [vmem:[#allocation7 + $0xc0] sm:$0xff]  ;;  %v617_v53 = vld [vmem:[#allocation7 + $0xc8] sm:$0xff]  ;;  %v618_v55 = vld [vmem:[#allocation7 + $0xd0] sm:$0xff]  ;;  %s1956_s30 = sshll.u32 %s2037_s15, 4  ;;  %s1957_s30 = int_to_ptr.vmem [resolvable:$false] %s1956_s30 }
  0xa2   : > { %1553 = vmatpush3.bf16.msra.mxu0 %v1552_v24  ;;  %v1606_v54 = vpack.c.bf16 %v617_v53, %v616_v52  ;;  %v619_v56 = vld [vmem:[#allocation7 + $0xd8] sm:$0xff]  ;;  %v620_v58 = vld [vmem:[#allocation7 + $0xe0] sm:$0xff]  ;;  %v621_v59 = vld [vmem:[#allocation7 + $0xe8] sm:$0xff]  ;;  %s1958_s9 = scalar_lea.vmem %s1957_s30, 2048  ;;  %p1959_p12 = scmp.lt.s32.totalorder %s2385_s20, %s1957_s30 }
  0xa3   : > { %1555 = vmatprep.subr.bf16.mxu0 %v1554_v26  ;;  %v1610_v57 = vpack.c.bf16 %v619_v56, %v618_v55  ;;  %v1614_v60 = vpack.c.bf16 %v621_v59, %v620_v58  ;;  %v622_v61 = vld [vmem:[#allocation7 + $0xf0] sm:$0xff]  ;;  %v623_v62 = vld [vmem:[#allocation7 + $0xf8] sm:$0xff]  ;;  %v591_v0 = vld [vmem:[#allocation7] sm:$0xff]  ;;  %p1960_p2 = scmp.lt.s32.totalorder %s1958_s9, %s1952_s11 }
  0xa4   : > { %1585 = vmatpush3.bf16.msra.mxu1 %v1584_v25  ;;  %v1618_v63 = vpack.c.bf16 %v623_v62, %v622_v61  ;;  %v592_v1 = vld [vmem:[#allocation7 + $0x8] sm:$0xff]  ;;  %v879_v5 = vld [vmem:[#allocation8] sm:$0xff]  ;;  %vm1277_vm1 = vmneg %vm577_vm0 }
  0xa5   : > { %1587 = vmatprep.subr.bf16.mxu1 %v1586_v30  ;;  %v2331_v2 = vpack.c.bf16 %v592_v1, %v591_v0  ;;  %v880_v3 = vld [vmem:[#allocation8 + $0x8] sm:$0xff]  ;;  %v883_v7 = vld [vmem:[#allocation8 + $0x20] sm:$0xff]  ;;  %p1961_p1 = por %p1960_p2, %p1959_p12 }
  0xa6   : > { %1557 = vmatpush3.bf16.msra.mxu0 %v1556_v34  ;;  %v884_v4 = vld [vmem:[#allocation8 + $0x28] sm:$0xff]  ;;  %v1688_v10 = vpack.c.bf16 %v883_v7, %v879_v5  ;;  %v887_v12 = vld [vmem:[#allocation8 + $0x40] sm:$0xff]  ;;  %v593_v7 = vld [vmem:[#allocation7 + $0x10] sm:$0xff] }
  0xa7   : > { %1591 = vmatprep.subr.bf16.mxu0 %v1590_v36  ;;  %v1686_v6 = vpack.c.bf16 %v884_v4, %v880_v3  ;;  %v888_v8 = vld [vmem:[#allocation8 + $0x48] sm:$0xff]  ;;  %v891_v13 = vld [vmem:[#allocation8 + $0x60] sm:$0xff]  ;;  %p1962_p4 = pnand %p1961_p1, %p1955_p7 }
  0xa8   : > { %1589 = vmatpush3.bf16.msra.mxu1 %v1588_v35  ;;  %v892_v9 = vld [vmem:[#allocation8 + $0x68] sm:$0xff]  ;;  %v1692_v16 = vpack.c.bf16 %v891_v13, %v887_v12  ;;  %v895_v19 = vld [vmem:[#allocation8 + $0x80] sm:$0xff] }
  0xa9   : > { %488 = vmatmul.mubr.f32.vlgmr.msra.gmra.mrb[0].mxu0 %v2308_v39  ;;  %v1690_v11 = vpack.c.bf16 %v892_v9, %v888_v8  ;;  %v896_v14 = vld [vmem:[#allocation8 + $0x88] sm:$0xff]  ;;  %1687 = vmatprep.subr.bf16.mxu1 %v1686_v6  ;;  %v899_v20 = vld [vmem:[#allocation8 + $0xa0] sm:$0xff]  ;;  %v594_v8 = vld [vmem:[#allocation7 + $0x18] sm:$0xff] }
  0xaa   : > { %492 = vmatprep.mubr.f32.mxu0 %v2314_v41  ;;  %1593 = vmatpush3.bf16.msra.mxu0 %v1590_v36  ;;  %v900_v15 = vld [vmem:[#allocation8 + $0xa8] sm:$0xff]  ;;  %v1696_v24 = vpack.c.bf16 %v899_v20, %v895_v19  ;;  %v903_v26 = vld [vmem:[#allocation8 + $0xc0] sm:$0xff] }
  0xab   : > { %563 = vmatmul.mubr.f32.vlgmr.msra.gmra.mrb[0].mxu1 %v2311_v40  ;;  %1595 = vmatprep.subr.bf16.mxu0 %v1594_v43  ;;  %v1694_v18 = vpack.c.bf16 %v900_v15, %v896_v14  ;;  %v904_v22 = vld [vmem:[#allocation8 + $0xc8] sm:$0xff]  ;;  %v907_v27 = vld [vmem:[#allocation8 + $0xe0] sm:$0xff] }
  0xac   : > { %567 = vmatprep.mubr.f32.mxu1 %v2317_v42  ;;  %1689 = vmatpush1.bf16.msra.mxu1 %v1688_v10  ;;  %v908_v23 = vld [vmem:[#allocation8 + $0xe8] sm:$0xff]  ;;  %v1700_v30 = vpack.c.bf16 %v907_v27, %v903_v26  ;;  %v911_v32 = vld [vmem:[#allocation8 + $0x100] sm:$0xff] }
  0xad   : > { %493 = vmatmul.mubr.f32.gmra.mrb[2].mxu0 %v2323_v46  ;;  %1691 = vmatprep.subr.bf16.mxu1 %v1690_v11  ;;  %v1698_v25 = vpack.c.bf16 %v908_v23, %v904_v22  ;;  %v912_v28 = vld [vmem:[#allocation8 + $0x108] sm:$0xff]  ;;  %v915_v33 = vld [vmem:[#allocation8 + $0x120] sm:$0xff]  ;;  %v1626_v11 = vpack.c.bf16 %v594_v8, %v593_v7  ;;  %v597_v23 = vld [vmem:[#allocation7 + $0x30] sm:$0xff] }
  0xae   : > { %1597 = vmatpush3.bf16.msra.mxu0 %v1594_v43  ;;  %v916_v29 = vld [vmem:[#allocation8 + $0x128] sm:$0xff]  ;;  %v1704_v36 = vpack.c.bf16 %v915_v33, %v911_v32  ;;  %v919_v38 = vld [vmem:[#allocation8 + $0x140] sm:$0xff] }
  0xaf   : > { %568 = vmatmul.mubr.f32.gmra.mrb[2].mxu1 %v2327_v47  ;;  %1599 = vmatprep.subr.bf16.mxu0 %v1598_v48  ;;  %v1702_v31 = vpack.c.bf16 %v916_v29, %v912_v28  ;;  %v920_v34 = vld [vmem:[#allocation8 + $0x148] sm:$0xff]  ;;  %v923_v43 = vld [vmem:[#allocation8 + $0x160] sm:$0xff]  ;;  %v602_v29 = vld [vmem:[#allocation7 + $0x58] sm:$0xff] }
  0xb0   : > { %1693 = vmatpush1.bf16.msra.mxu1 %v1692_v16  ;;  %v924_v35 = vld [vmem:[#allocation8 + $0x168] sm:$0xff]  ;;  %v927_v50 = vld [vmem:[#allocation8 + $0x180] sm:$0xff] }
  0xb1   : > { %1695 = vmatprep.subr.bf16.mxu1 %v1694_v18  ;;  %v1706_v37 = vpack.c.bf16 %v924_v35, %v920_v34  ;;  %v928_v44 = vld [vmem:[#allocation8 + $0x188] sm:$0xff]  ;;  %v595_v13 = vld [vmem:[#allocation7 + $0x20] sm:$0xff]  ;;  %v605_v34 = vld [vmem:[#allocation7 + $0x70] sm:$0xff] }
  0xb2   : > { %1601 = vmatpush3.bf16.msra.mxu0 %v1598_v48  ;;  %v932_v45 = vld [vmem:[#allocation8 + $0x1a8] sm:$0xff]  ;;  %v1708_v48 = vpack.c.bf16 %v923_v43, %v919_v38  ;;  %v599_v26 = vld [vmem:[#allocation7 + $0x40] sm:$0xff]  ;;  %v606_v35 = vld [vmem:[#allocation7 + $0x78] sm:$0xff] }
  0xb3   : > { %1603 = vmatprep.subr.bf16.mxu0 %v1602_v51  ;;  %v1710_v49 = vpack.c.bf16 %v932_v45, %v928_v44  ;;  %v596_v14 = vld [vmem:[#allocation7 + $0x28] sm:$0xff]  ;;  %v777_v44 = vld [vmem:[#allocation7 + $0x110] sm:$0xff]  ;;  %v778_v45 = vld [vmem:[#allocation7 + $0x118] sm:$0xff] }
  0xb4   : > { %1697 = vmatpush1.bf16.msra.mxu1 %v1696_v24  ;;  %v1630_v19 = vpack.c.bf16 %v596_v14, %v595_v13  ;;  %v598_v24 = vld [vmem:[#allocation7 + $0x38] sm:$0xff]  ;;  %v600_v27 = vld [vmem:[#allocation7 + $0x48] sm:$0xff]  ;;  %v935_v7 = vld [vmem:[#allocation8 + $0x1c0] sm:$0xff]  ;;  %v2036_v14 = vmov 0.0  }
  0xb5   : > { %1699 = vmatprep.subr.bf16.mxu1 %v1698_v25  ;;  %v1634_v25 = vpack.c.bf16 %v598_v24, %v597_v23  ;;  %v1638_v28 = vpack.c.bf16 %v600_v27, %v599_v26  ;;  %v604_v32 = vld [vmem:[#allocation7 + $0x68] sm:$0xff]  ;;  %v939_v8 = vld [vmem:[#allocation8 + $0x1e0] sm:$0xff]  ;;  %1029 = vmatprep.mubr.f32.mxu1 %v2036_v14 }
  0xb6   : > { %1605 = vmatpush3.bf16.msra.mxu0 %v1602_v51  ;;  %v931_v51 = vld [vmem:[#allocation8 + $0x1a0] sm:$0xff]  ;;  %v776_v38 = vld [vmem:[#allocation7 + $0x108] sm:$0xff] }
  0xb7   : > { %1607 = vmatprep.subr.bf16.mxu0 %v1606_v54  ;;  %v1712_v52 = vpack.c.bf16 %v931_v51, %v927_v50  ;;  %v780_v50 = vld [vmem:[#allocation7 + $0x128] sm:$0xff] }
  0xb8   : > { %1701 = vmatpush1.bf16.msra.mxu1 %v1700_v30 }
  0xb9   : > { %1703 = vmatprep.subr.bf16.mxu1 %v1702_v31  ;;  %v603_v31 = vld [vmem:[#allocation7 + $0x60] sm:$0xff] }
  0xba   : > { %1609 = vmatpush3.bf16.msra.mxu0 %v1606_v54  ;;  %v1276_v54 = vld [vmem:[%s2440_s2] ss:$0 sm:$0xff]  ;;  %v1646_v33 = vpack.c.bf16 %v604_v32, %v603_v31 }
  0xbb   : > { %1611 = vmatprep.subr.bf16.mxu0 %v1610_v57 }
  0xbc   : > { %1705 = vmatpush1.bf16.msra.mxu1 %v1704_v36  ;;  %v1650_v36 = vpack.c.bf16 %v606_v35, %v605_v34  ;;  %v897_v34 = vld [vmem:[#allocation8 + $0x90] sm:$0xff] }
  0xbd   : > { %1707 = vmatprep.subr.bf16.mxu1 %v1706_v37  ;;  %v775_v37 = vld [vmem:[#allocation7 + $0x100] sm:$0xff]  ;;  %v901_v35 = vld [vmem:[#allocation8 + $0xb0] sm:$0xff] }
  0xbe   : > { %1613 = vmatpush3.bf16.msra.mxu0 %v1610_v57  ;;  %v1654_v43 = vpack.c.bf16 %v776_v38, %v775_v37  ;;  %v910_v37 = vld [vmem:[#allocation8 + $0xf8] sm:$0xff]  ;;  %v1728_v38 = vpack.c.bf16 %v901_v35, %v897_v34 }
  0xbf   : > { %1615 = vmatprep.subr.bf16.mxu0 %v1614_v60 }
  0xc0   : > { %1709 = vmatpush1.bf16.msra.mxu1 %v1708_v48  ;;  %v1658_v48 = vpack.c.bf16 %v778_v45, %v777_v44  ;;  %v905_v44 = vld [vmem:[#allocation8 + $0xd0] sm:$0xff] }
  0xc1   : > { %1711 = vmatprep.subr.bf16.mxu1 %v1710_v49  ;;  %v779_v49 = vld [vmem:[#allocation7 + $0x120] sm:$0xff]  ;;  %v909_v45 = vld [vmem:[#allocation8 + $0xf0] sm:$0xff] }
  0xc2   : > { %1617 = vmatpush3.bf16.msra.mxu0 %v1614_v60  ;;  %v1662_v51 = vpack.c.bf16 %v780_v50, %v779_v49  ;;  %v918_v49 = vld [vmem:[#allocation8 + $0x138] sm:$0xff]  ;;  %v1732_v50 = vpack.c.bf16 %v909_v45, %v905_v44 }
  0xc3   : > { %1619 = vmatprep.subr.bf16.mxu0 %v1618_v63 }
  0xc4   : > { %1713 = vmatpush1.bf16.msra.mxu1 %v1712_v52  ;;  %v781_v52 = vld [vmem:[#allocation7 + $0x130] sm:$0xff] }
  0xc6   : > { %1621 = vmatpush3.bf16.msra.mxu0 %v1618_v63 }
  0xc7   : > { %1623 = vmatprep.subr.bf16.mxu0 %v2331_v2 }
 0x17c   : > { %v1323_v53 = vpop.f32.mrb[0].mxu0 }
 0x17d   : > { %v1324_v55 = vpop.f32.mrb[1].mxu0 }
 0x17e   : > { %v1361_v56 = vpop.f32.mrb[0].mxu1  ;;  %v1325_v57 = vadd.f32 %v1324_v55, %v1323_v53  ;;  %v782_v53 = vld [vmem:[#allocation7 + $0x138] sm:$0xff]  ;;  %v783_v55 = vld [vmem:[#allocation7 + $0x140] sm:$0xff] }
 0x17f   : > { %v1362_v58 = vpop.f32.mrb[1].mxu1 }
 0x180   : > { %v1363_v59 = vadd.f32 %v1362_v58, %v1361_v56  ;;  %v490_v60 = vadd.f32 %v1325_v57, %v1276_v54  ;;  %v1326_v61 = vpop.f32.mrb[2].mxu0  ;;  %v784_v56 = vld [vmem:[#allocation7 + $0x148] sm:$0xff]  ;;  %v785_v58 = vld [vmem:[#allocation7 + $0x150] sm:$0xff] }
 0x181   : > { %v1327_v62 = vpop.f32.mrb[3].mxu0  ;;  %v1670_v57 = vpack.c.bf16 %v784_v56, %v783_v55  ;;  %v926_v55 = vld [vmem:[#allocation8 + $0x178] sm:$0xff] }
 0x182   : > { %v1364_v63 = vpop.f32.mrb[2].mxu1  ;;  %v565_v0 = vadd.f32 %v1363_v59, %v490_v60  ;;  %v1328_v1 = vadd.f32 %v1327_v62, %v1326_v61  ;;  %v786_v59 = vld [vmem:[#allocation7 + $0x158] sm:$0xff]  ;;  %v787_v61 = vld [vmem:[#allocation7 + $0x160] sm:$0xff]  ;;  %v788_v62 = vld [vmem:[#allocation7 + $0x168] sm:$0xff] }
 0x183   : > { %v1365_v3 = vpop.f32.mrb[3].mxu1  ;;  %v1674_v60 = vpack.c.bf16 %v786_v59, %v785_v58  ;;  %v921_v58 = vld [vmem:[#allocation8 + $0x150] sm:$0xff] }
 0x184   : > { %v1366_v4 = vadd.f32 %v1365_v3, %v1364_v63  ;;  %v573_v5 = vmax.f32 %v565_v0, 0.0  ;;  %v495_v6 = vadd.f32 %v1328_v1, %v1276_v54  ;;  %v1666_v54 = vpack.c.bf16 %v782_v53, %v781_v52  ;;  %v789_v0 = vld [vmem:[#allocation7 + $0x170] sm:$0xff]  ;;  %v790_v1 = vld [vmem:[#allocation7 + $0x178] sm:$0xff] }
 0x185   : > { %v1678_v63 = vpack.c.bf16 %v788_v62, %v787_v61  ;;  %v1682_v3 = vpack.c.bf16 %v790_v1, %v789_v0  ;;  %v913_v52 = vld [vmem:[#allocation8 + $0x110] sm:$0xff]  ;;  %v934_v61 = vld [vmem:[#allocation8 + $0x1b8] sm:$0xff] }
 0x186   : > { %v570_v9 = vadd.f32 %v1366_v4, %v495_v6  ;;  %1453 = vmatprep.mubr.f32.mxu0 %v573_v5  ;;  %v578_v12 = vrot.slane %v573_v5, 7  ;;  %v585_v16 = vrot.slane %v573_v5, 1  ;;  %v936_v4 = vld [vmem:[#allocation8 + $0x1c8] sm:$0xff]  ;;  %v917_v53 = vld [vmem:[#allocation8 + $0x130] sm:$0xff] }
 0x187   : > { %v940_v5 = vld [vmem:[#allocation8 + $0x1e8] sm:$0xff]  ;;  %v1736_v56 = vpack.c.bf16 %v917_v53, %v913_v52  ;;  %v925_v59 = vld [vmem:[#allocation8 + $0x170] sm:$0xff] }
 0x188   : > { %v2337_v10 = vmax.f32 %v570_v9, 0.0  ;;  %v1714_v6 = vpack.c.bf16 %v940_v5, %v936_v4  ;;  %v1716_v9 = vpack.c.bf16 %v939_v8, %v935_v7  ;;  %v1740_v62 = vpack.c.bf16 %v925_v59, %v921_v58  ;;  %v929_v0 = vld [vmem:[#allocation8 + $0x190] sm:$0xff]  ;;  %v942_v4 = vld [vmem:[#allocation8 + $0x1f8] sm:$0xff] }
 0x189   : > { %v933_v1 = vld [vmem:[#allocation8 + $0x1b0] sm:$0xff] }
 0x18a   : > { %v579_v15 = vrot.slane %v2337_v10, 7  ;;  %1454 = vmatmul.mubr.f32.vlgmr.msra.gmra.mrb[4].mxu0 %v2337_v10  ;;  %v586_v18 = vrot.slane %v2337_v10, 1  ;;  %1715 = vmatprep.subr.bf16.mxu1 %v1714_v6  ;;  %v1280_v10 = vld [vmem:[%s2442_s4] ss:$0 sm:$0xff]  ;;  %v1744_v5 = vpack.c.bf16 %v933_v1, %v929_v0  ;;  %v937_v7 = vld [vmem:[#allocation8 + $0x1d0] sm:$0xff] }
 0x18b   : > { %1625 = vmatpush3.bf16.msra.mxu0 %v2331_v2  ;;  %1488 = vmatprep.mubr.msk.f32.mxu0 %vm1277_vm1, %v578_v12  ;;  %v601_v2 = vld [vmem:[#allocation7 + $0x50] sm:$0xff] }
 0x18c   : > { %1627 = vmatprep.subr.bf16.mxu0 %v1626_v11  ;;  %v580_v20 = vsel %vm577_vm0, %v578_v12, %v579_v15  ;;  %v587_v22 = vsel %vm584_vm2, %v585_v16, %v586_v18  ;;  %v1642_v30 = vpack.c.bf16 %v602_v29, %v601_v2  ;;  %1717 = vmatpush1.bf16.msra.mxu1 %v1716_v9  ;;  %v886_v12 = vld [vmem:[#allocation8 + $0x38] sm:$0xff]  ;;  %v881_v16 = vld [vmem:[#allocation8 + $0x10] sm:$0xff] }
 0x18d   : > { %v893_v2 = vld [vmem:[#allocation8 + $0x70] sm:$0xff]  ;;  %v898_v29 = vld [vmem:[#allocation8 + $0x98] sm:$0xff] }
 0x18e   : > { %v941_v8 = vld [vmem:[#allocation8 + $0x1f0] sm:$0xff] }
 0x18f   : > { %1629 = vmatpush3.bf16.msra.mxu0 %v1626_v11  ;;  %v882_v11 = vld [vmem:[#allocation8 + $0x18] sm:$0xff]  ;;  %v1748_v9 = vpack.c.bf16 %v941_v8, %v937_v7 }
 0x190   : > { %1631 = vmatprep.subr.bf16.mxu0 %v1630_v19  ;;  %v1718_v13 = vpack.c.bf16 %v886_v12, %v882_v11  ;;  %v945_v11 = vlaneseq }
 0x192   : > { %1719 = vmatprep.subr.bf16.mxu1 %v1718_v13  ;;  %v946_v12 = vshrl.u32 %v945_v11, 7 }
 0x193   : > { %1633 = vmatpush3.bf16.msra.mxu0 %v1630_v19 }
 0x194   : > { %1635 = vmatprep.subr.bf16.mxu0 %v1634_v25  ;;  %v947_v13 = vsub.s32 0, %v946_v12 }
 0x197   : > { %1637 = vmatpush3.bf16.msra.mxu0 %v1634_v25 }
 0x198   : > { %1639 = vmatprep.subr.bf16.mxu0 %v1638_v28 }
 0x19b   : > { %1641 = vmatpush3.bf16.msra.mxu0 %v1638_v28  ;;  %v889_v28 = vld [vmem:[#allocation8 + $0x50] sm:$0xff] }
 0x19c   : > { %1643 = vmatprep.subr.bf16.mxu0 %v1642_v30  ;;  %v1724_v31 = vpack.c.bf16 %v893_v2, %v889_v28 }
 0x19f   : > { %1645 = vmatpush3.bf16.msra.mxu0 %v1642_v30  ;;  %v902_v30 = vld [vmem:[#allocation8 + $0xb8] sm:$0xff] }
 0x1a0   : > { %1647 = vmatprep.subr.bf16.mxu0 %v1646_v33 }
 0x1a3   : > { %1649 = vmatpush3.bf16.msra.mxu0 %v1646_v33  ;;  %v1726_v33 = vpack.c.bf16 %v902_v30, %v898_v29 }
 0x1a4   : > { %1651 = vmatprep.subr.bf16.mxu0 %v1650_v36 }
 0x1a7   : > { %1653 = vmatpush3.bf16.msra.mxu0 %v1650_v36  ;;  %v906_v36 = vld [vmem:[#allocation8 + $0xd8] sm:$0xff] }
 0x1a8   : > { %1655 = vmatprep.subr.bf16.mxu0 %v1654_v43 }
 0x1aa   : > { %1489 = vmatmul.mubr.f32.vlgmr.msra.gmra.mrb[4].mxu0 %v580_v20  ;;  %v890_v20 = vld [vmem:[#allocation8 + $0x58] sm:$0xff] }
 0x1ab   : > { %1657 = vmatpush3.bf16.msra.mxu0 %v1654_v43  ;;  %1523 = vmatprep.mubr.f32.mxu0 %v587_v22  ;;  %v894_v22 = vld [vmem:[#allocation8 + $0x78] sm:$0xff]  ;;  %v1730_v43 = vpack.c.bf16 %v910_v37, %v906_v36 }
 0x1ac   : > { %1659 = vmatprep.subr.bf16.mxu0 %v1658_v48  ;;  %v1722_v27 = vpack.c.bf16 %v894_v22, %v890_v20 }
 0x1af   : > { %1661 = vmatpush3.bf16.msra.mxu0 %v1658_v48  ;;  %v914_v48 = vld [vmem:[#allocation8 + $0x118] sm:$0xff] }
 0x1b0   : > { %1663 = vmatprep.subr.bf16.mxu0 %v1662_v51 }
 0x1b3   : > { %1665 = vmatpush3.bf16.msra.mxu0 %v1662_v51  ;;  %v1734_v51 = vpack.c.bf16 %v918_v49, %v914_v48 }
 0x1b4   : > { %1667 = vmatprep.subr.bf16.mxu0 %v1666_v54 }
 0x1b7   : > { %1669 = vmatpush3.bf16.msra.mxu0 %v1666_v54  ;;  %v922_v54 = vld [vmem:[#allocation8 + $0x158] sm:$0xff] }
 0x1b8   : > { %1671 = vmatprep.subr.bf16.mxu0 %v1670_v57 }
 0x1bb   : > { %1673 = vmatpush3.bf16.msra.mxu0 %v1670_v57  ;;  %v1738_v57 = vpack.c.bf16 %v926_v55, %v922_v54 }
 0x1bc   : > { %1675 = vmatprep.subr.bf16.mxu0 %v1674_v60 }
 0x1bf   : > { %1677 = vmatpush3.bf16.msra.mxu0 %v1674_v60  ;;  %v930_v60 = vld [vmem:[#allocation8 + $0x198] sm:$0xff] }
 0x1c0   : > { %1679 = vmatprep.subr.bf16.mxu0 %v1678_v63 }
 0x1c3   : > { %1681 = vmatpush3.bf16.msra.mxu0 %v1678_v63  ;;  %v1742_v63 = vpack.c.bf16 %v934_v61, %v930_v60 }
 0x1c4   : > { %1683 = vmatprep.subr.bf16.mxu0 %v1682_v3 }
 0x1c7   : > { %1685 = vmatpush3.bf16.msra.mxu0 %v1682_v3  ;;  %v938_v3 = vld [vmem:[#allocation8 + $0x1d8] sm:$0xff] }
 0x1c8   : > { %v1746_v6 = vpack.c.bf16 %v942_v4, %v938_v3 }
 0x1ca   : > { %1524 = vmatmul.mubr.msk.f32.vlgmr.msra.gmra.mrb[4].mxu0 %vm584_vm2, %v586_v18  ;;  %v885_v18 = vld [vmem:[#allocation8 + $0x30] sm:$0xff] }
 0x1cb   : > { %v1720_v24 = vpack.c.bf16 %v885_v18, %v881_v16 }
 0x29d   : > { %v1525_v15 = vpop.f32.mrb[4].mxu0 }
 0x29e   : > { %v857_v19 = vpop.f32.mrb[5].mxu0  ;;  %v2357_v25 = vadd.f32 %v1525_v15, %v1280_v10  ;;  %v951_v15 = vsub.s32 1, %v946_v12 }
 0x29f   : > { %v2355_v23 = vadd.f32 %v1280_v10, %v857_v19  ;;  %v943_v10 = vld [vmem:[%s2444_s6] sm:$0xf] }
 0x2a0   : > { %v878_v32 = vmax.f32 %v2357_v25, 0.0  ;;  %v948_v16 = vrot.slane %v943_v10, %v947_v13  ;;  %v952_v18 = vrot.slane %v943_v10, %v951_v15 }
 0x2a1   : > { %v877_v26 = vmax.f32 %v2355_v23, 0.0 }
 0x2a3   : > { %1030 = vmatmul.mubr.f32.vlgmr.msra.gmra.mrb[4].mxu1 %v877_v26 }
 0x2a4   : > { %1721 = vmatpush1.bf16.msra.mxu1 %v1720_v24  ;;  %1035 = vmatprep.mubr.f32.mxu1 %v2036_v14 }
 0x2a5   : > { %1723 = vmatprep.subr.bf16.mxu1 %v1722_v27 }
 0x2a7   : > { %1036 = vmatmul.mubr.f32.gmra.mrb[6].mxu1 %v878_v32 }
 0x2a8   : > { %1725 = vmatpush1.bf16.msra.mxu1 %v1724_v31  ;;  %1106 = vmatprep.mubr.f32.mxu1 %v2036_v14 }
 0x2a9   : > { %1727 = vmatprep.subr.bf16.mxu1 %v1726_v33  ;;  %v959_v33 = vsub.s32 3, %v946_v12 }
 0x2ab   : > { %v960_v35 = vrot.slane %v943_v10, %v959_v33 }
 0x2ac   : > { %1729 = vmatpush1.bf16.msra.mxu1 %v1728_v38 }
 0x2ad   : > { %1731 = vmatprep.subr.bf16.mxu1 %v1730_v43 }
 0x2b0   : > { %1733 = vmatpush1.bf16.msra.mxu1 %v1732_v50 }
 0x2b1   : > { %1735 = vmatprep.subr.bf16.mxu1 %v1734_v51 }
 0x2b4   : > { %1737 = vmatpush1.bf16.msra.mxu1 %v1736_v56 }
 0x2b5   : > { %1739 = vmatprep.subr.bf16.mxu1 %v1738_v57 }
 0x2b8   : > { %1741 = vmatpush1.bf16.msra.mxu1 %v1740_v62 }
 0x2b9   : > { %1743 = vmatprep.subr.bf16.mxu1 %v1742_v63 }
 0x2bc   : > { %1745 = vmatpush1.bf16.msra.mxu1 %v1744_v5 }
 0x2bd   : > { %1747 = vmatprep.subr.bf16.mxu1 %v1746_v6 }
 0x2c0   : > { %1749 = vmatpush1.bf16.msra.mxu1 %v1748_v9 }
 0x2c3   : > { %1107 = vmatmul.mubr.f32.vlgmr.msra.gmra.mrb[8].mxu1 %v877_v26 }
 0x2c4   : > { %1112 = vmatprep.mubr.f32.mxu1 %v2036_v14 }
 0x2c7   : > { %1113 = vmatmul.mubr.f32.gmra.mrb[10].mxu1 %v878_v32  ;;  %v955_v32 = vsub.s32 2, %v946_v12 }
 0x2c9   : > { %v956_v34 = vrot.slane %v943_v10, %v955_v32 }
 0x376   : > { %v1031_v19 = vpop.f32.mrb[4].mxu1 }
 0x377   : > { %v1032_v20 = vadd.f32 %v1031_v19, %v948_v16  ;;  %v1033_v22 = vpop.f32.mrb[5].mxu1 }
 0x378   : > { %v1034_v23 = vadd.f32 %v1033_v22, %v952_v18 }
 0x379   : > { %v1119_v24 = vadd.f32 %v1032_v20, %v2308_v39 }
 0x37a   : > { %v1120_v14 = vadd.f32 %v1034_v23, %v2300_v17  ;;  %v1037_v25 = vpop.f32.mrb[6].mxu1 }
 0x37b   : > { %v1127_v26 = vmax.f32 %v1119_v24, 0.0  ;;  %v1038_v27 = vadd.f32 %v1037_v25, %v948_v16  ;;  %v1039_v28 = vpop.f32.mrb[7].mxu1 }
 0x37c   : > { %v1128_v2 = vmax.f32 %v1120_v14, 0.0  ;;  %v1040_v29 = vadd.f32 %v1039_v28, %v952_v18 }
 0x37d   : > { %1135 = vst [vmem:[%s2371_s17] sm:$0xff] %v1127_v26  ;;  %v1123_v30 = vadd.f32 %v1038_v27, %v2323_v46 }
 0x37e   : > { %1136 = vst [vmem:[%s2371_s17 + $0x8] sm:$0xff] %v1128_v2  ;;  %v1124_v39 = vadd.f32 %v1040_v29, %v2314_v41 }
 0x37f   : > { %v1131_v17 = vmax.f32 %v1123_v30, 0.0 }
 0x380   : > { %v1132_v31 = vmax.f32 %v1124_v39, 0.0 }
 0x381   : > { %1139 = vst [vmem:[%s2371_s17 + $0x20] sm:$0xff] %v1131_v17 }
 0x382   : > { %1140 = vst [vmem:[%s2371_s17 + $0x28] sm:$0xff] %v1132_v31 }
 0x396   : > { %v1108_v36 = vpop.f32.mrb[8].mxu1 }
 0x397   : > { %v1109_v37 = vadd.f32 %v1108_v36, %v956_v34  ;;  %v1110_v38 = vpop.f32.mrb[9].mxu1 }
 0x398   : > { %v1111_v43 = vadd.f32 %v1110_v38, %v960_v35 }
 0x399   : > { %v1121_v46 = vadd.f32 %v1109_v37, %v2311_v40 }
 0x39a   : > { %v1122_v41 = vadd.f32 %v1111_v43, %v2304_v21  ;;  %v1114_v44 = vpop.f32.mrb[10].mxu1 }
 0x39b   : > { %v1129_v45 = vmax.f32 %v1121_v46, 0.0  ;;  %v1115_v48 = vadd.f32 %v1114_v44, %v956_v34  ;;  %v1116_v49 = vpop.f32.mrb[11].mxu1 }
 0x39c   : > { %v1130_v50 = vmax.f32 %v1122_v41, 0.0  ;;  %v1117_v51 = vadd.f32 %v1116_v49, %v960_v35 }
 0x39d   : > { %1137 = vst [vmem:[%s2371_s17 + $0x10] sm:$0xff] %v1129_v45  ;;  %v1125_v52 = vadd.f32 %v1115_v48, %v2327_v47 }
 0x39e   : > { %1138 = vst [vmem:[%s2371_s17 + $0x18] sm:$0xff] %v1130_v50  ;;  %v1126_v21 = vadd.f32 %v1117_v51, %v2317_v42 }
 0x39f   : > { %v1133_v40 = vmax.f32 %v1125_v52, 0.0 }
 0x3a0   : > { %v1134_v53 = vmax.f32 %v1126_v21, 0.0 }
 0x3a1   : > { %1141 = vst [vmem:[%s2371_s17 + $0x30] sm:$0xff] %v1133_v40 }
 0x3a2   : > { %1142 = vst [vmem:[%s2371_s17 + $0x38] sm:$0xff] %v1134_v53 }
 0x3a3   : > { %1965 = shalt.err (!%p1962_p4)
}
 0x3a4   : > { %s1966_s14 = scalar_lea.hbm %s2392_s23, 1024  ;;  %s1970_s13 = scalar_lea.hbm %s2445_s7, 2048 }
 0x3a5   : > { %p1967_p9 = scmp.ne.s32.totalorder %s2392_s23, %s1966_s14  ;;  %p1971_p8 = scmp.lt.u32.totalorder %s2392_s23, %s2445_s7 }
 0x3a6   : > { %p1972_p13 = scmp.lt.u32.totalorder %s1970_s13, %s1966_s14  ;;  %p1974_p10 = scmp.lt.u32.totalorder %s1966_s14, %s2392_s23 }
 0x3a7   : > { %p1968_p0 = pnand %p1967_p9, %p2228_p5 }
 0x3a8   : > { %p1973_p6 = por %p1972_p13, %p1971_p8 }
 0x3a9   : > { %p1969_p11 = pneg %p1968_p0 }
 0x3aa   : > { %p1975_p3 = por %p1974_p10, %p1973_p6 }
 0x3ac   : > { %p1976_p7 = pnand %p1975_p3, %p1969_p11 }
 0x3ae   : > { %1979 = shalt.err (!%p1976_p7)
}
 0x3af   : > { %s2038_s16 = smov 512   ;;  %s2039_s29 = smov 32  }
 0x3b0   : > { %1768 = dma.vmem_to_hbm [thread:$0]  (%p2228_p5), %s2385_s20, 1024, %s2392_s23, %s1144_s28, %s2038_s16, %s2038_s16, %s2039_s29  }
 0x3b1 PF: > { %s2465_s11 = sld [smem:[#allocation15_spill]]  ;;  %s1173_s15 = sand.u32 1, %s2014_s24  }
 0x3b2   : > { %p2467_p2 = scmp.ge.s32.totalorder %s2026_s27, 2  ;;  %s1174_s30 = scalar_lea.sflag [#allocation4], %s1173_s15 }
 0x3b7   : > { %p2466_p12 = scmp.ne.s32.totalorder %s2465_s11, 0 }
 0x3b9   : > { %p1785_p1 = pnand %p2467_p2, %p2466_p12 }
 0x3bb   : > { %2009 = dma.done.wait (!%p1785_p1), %s1174_s30, 1024  }
 0x3bc   : > { %2011 = vsyncadd (!%p1785_p1), %s1174_s30, 4294966272  ;;  %p22_p4 = scmp.ge.s32.totalorder %s2214_s8, 4   ;;  %s2468_s24 = smov %s2018_s25 }
 0x3bd   : > { %s2469_s25 = smov %s2022_s26  ;;  %s2470_s26 = smov %s2224_s19 }
 0x3be   : > { %s2471_s27 = smov %s2214_s8  ;;  %24 = sbr.rel (!%p22_p4) target bundleno = 7 (0x7), region = 107 }
 0x3c5   :  { %1179 = vsyncpa [#allocation3], 1 }
 0x3c6   :  { %1181 = vsyncpa [#allocation3 + $0x1], 1 }
 0x3c7   :  { %1182 = vsyncpa [#allocation6], 1 }
 0x3c8   :  { %1183 = vsyncpa [#allocation9], 1 }
 0x3c9   :  { %1184 = vsyncpa [#allocation4], 1 }
 0x3ca   :  { %1186 = vsyncpa [#allocation4 + $0x1], 1 }

</bundles_post_ra>
